<compile_context>
chip_gen: v7x
topology: tpu7x:2x2x1
jax: 0.10.0
libtpu: 0.0.40
codegen_flags: <defaults>
</compile_context>

<pallas_src>
import jax
import jax.numpy as jnp
from jax.experimental import pallas as pl
from jax.experimental.pallas import tpu as pltpu

A_PAD = 128  # lane-dense padded action dimension


def _round_up(x, m):
    return ((x + m - 1) // m) * m


def policy_kernel(x_ref, w1_ref, b1_ref, w2_ref, b2_ref, out_ref):
    # fc1: [TB, S](bf16) @ [S, H](bf16) -> f32 accumulation, + f32 bias row
    h = jnp.dot(x_ref[...], w1_ref[...], preferred_element_type=jnp.float32) + b1_ref[...]
    # ReLU in f32 (VPU)
    h = jnp.maximum(h, 0.0)
    # fc2: [TB, H](bf16) @ [H, 128](bf16, zero-padded cols) -> f32, + f32 bias
    # (padded bias lanes are -inf so they vanish in the softmax).
    logits = (
        jnp.dot(h.astype(jnp.bfloat16), w2_ref[...], preferred_element_type=jnp.float32)
        + b2_ref[...]
    )
    # Numerically stable softmax over the full 128-lane axis.
    m = jnp.max(logits, axis=-1, keepdims=True)
    e = jnp.exp(logits - m)                      # exp(-inf)=0 on padded lanes
    denom = jnp.sum(e, axis=-1, keepdims=True)
    # Divide on the EUP via approximate reciprocal (frees the VALU slot).
    out_ref[...] = (e * pl.reciprocal(denom, approx=True)).astype(out_ref.dtype)


def policy_forward(state, w1, b1, w2, b2, *, tb=1024):
    """state: [B, state_dim] f32 -> action_probs: [B, action_dim] f32."""
    B, S = state.shape
    H = w1.shape[1]
    A = w2.shape[1]
    assert tb % 8 == 0, "tile size must be a multiple of the 8-row sublane"

    # Effective tile: never larger than the (sublane-rounded) batch.
    tb_eff = min(tb, _round_up(B, 8))
    b_pad = _round_up(B, tb_eff)
    grid = (b_pad // tb_eff,)

    # --- prepare inputs (bf16 matmul operands, lane-dense padded fc2) ---
    x = jnp.zeros((b_pad, S), jnp.bfloat16).at[:B, :].set(state.astype(jnp.bfloat16))
    w1_b = w1.astype(jnp.bfloat16)
    b1_f = b1.reshape(1, H).astype(jnp.float32)
    w2_p = jnp.zeros((H, A_PAD), jnp.bfloat16).at[:, :A].set(w2.astype(jnp.bfloat16))
    b2_p = jnp.full((1, A_PAD), -jnp.inf, jnp.float32).at[:, :A].set(
        b2.reshape(1, A).astype(jnp.float32)
    )

    out = pl.pallas_call(
        policy_kernel,
        out_shape=jax.ShapeDtypeStruct((b_pad, A_PAD), jnp.float32),
        grid=grid,
        in_specs=[
            pl.BlockSpec((tb_eff, S), lambda i: (i, 0)),      # state: streams with i
            pl.BlockSpec((S, H), lambda i: (0, 0)),            # w1: VMEM-resident
            pl.BlockSpec((1, H), lambda i: (0, 0)),            # b1: VMEM-resident
            pl.BlockSpec((H, A_PAD), lambda i: (0, 0)),        # w2: VMEM-resident
            pl.BlockSpec((1, A_PAD), lambda i: (0, 0)),        # b2: VMEM-resident
        ],
        out_specs=pl.BlockSpec((tb_eff, A_PAD), lambda i: (i, 0)),
        compiler_params=pltpu.CompilerParams(
            dimension_semantics=("parallel",),                 # 2 TCs on v7x
        ),
    )(x, w1_b, b1_f, w2_p, b2_p)

    return out[:B, :A]


def init_params(key, state_dim, hidden_dim, action_dim):
    # Deterministic init mimicking torch.nn.Linear (uniform +/- 1/sqrt(fan_in)).
    k1, k2, k3, k4 = jax.random.split(key, 4)
    lim1 = 1.0 / jnp.sqrt(state_dim)
    lim2 = 1.0 / jnp.sqrt(hidden_dim)
    w1 = jax.random.uniform(k1, (state_dim, hidden_dim), jnp.float32, -lim1, lim1)
    b1 = jax.random.uniform(k2, (1, hidden_dim), jnp.float32, -lim1, lim1)
    w2 = jax.random.uniform(k3, (hidden_dim, action_dim), jnp.float32, -lim2, lim2)
    b2 = jax.random.uniform(k4, (1, action_dim), jnp.float32, -lim2, lim2)
    return w1, b1, w2, b2


def _reference(state, w1, b1, w2, b2, bf16=False):
    if bf16:
        xb = state.astype(jnp.bfloat16)
        h = jnp.maximum(
            jnp.dot(xb, w1.astype(jnp.bfloat16), preferred_element_type=jnp.float32) + b1,
            0.0,
        )
        logits = (
            jnp.dot(h.astype(jnp.bfloat16), w2.astype(jnp.bfloat16),
                    preferred_element_type=jnp.float32)
            + b2
        )
    else:
        h = jnp.maximum(state @ w1 + b1, 0.0)
        logits = h @ w2 + b2
    return jax.nn.softmax(logits, axis=-1)


if __name__ == "__main__":
    # CartPole-v1: state_dim = 4, action_dim = 2; hidden = 128 per the module.
    STATE_DIM, HIDDEN_DIM, ACTION_DIM = 4, 128, 2
    BATCH = 2

    key = jax.random.PRNGKey(0)
    k_params, k_state, k_big = jax.random.split(key, 3)
    w1, b1, w2, b2 = init_params(k_params, STATE_DIM, HIDDEN_DIM, ACTION_DIM)

    # --- small-batch check (single 8-row tile, grid=1) ---
    state = jax.random.normal(k_state, (BATCH, STATE_DIM), jnp.float32)
    probs = jax.block_until_ready(policy_forward(state, w1, b1, w2, b2))
    assert probs.shape == (BATCH, ACTION_DIM)
    ref_bf16 = _reference(state, w1, b1, w2, b2, bf16=True)
    ref_f32 = _reference(state, w1, b1, w2, b2, bf16=False)
    assert jnp.allclose(probs, ref_bf16, atol=5e-3), "mismatch vs bf16 reference"
    assert jnp.allclose(probs, ref_f32, atol=2e-2), "mismatch vs f32 reference"
    assert jnp.allclose(jnp.sum(probs, axis=-1), 1.0, atol=5e-3)

    # --- larger batch exercises the multi-tile grid with VMEM-resident weights ---
    big_state = jax.random.normal(k_big, (2048, STATE_DIM), jnp.float32)
    big_probs = jax.block_until_ready(policy_forward(big_state, w1, b1, w2, b2, tb=1024))
    big_ref = _reference(big_state, w1, b1, w2, b2, bf16=True)
    assert big_probs.shape == (2048, ACTION_DIM)
    assert jnp.allclose(big_probs, big_ref, atol=5e-3), "mismatch vs reference (tiled)"
    assert jnp.allclose(jnp.sum(big_probs, axis=-1), 1.0, atol=5e-3)

    print("KERNEL_OK")
</pallas_src>

<mosaic_0001>
module attributes {stable_mosaic.version = 11 : i64} {
  func.func @policy_kernel(%arg0: i32, %arg1: memref<8x4xbf16, #tpu.memory_space<vmem>>, %arg2: memref<4x128xbf16, #tpu.memory_space<vmem>>, %arg3: memref<1x128xf32, #tpu.memory_space<vmem>>, %arg4: memref<128x128xbf16, #tpu.memory_space<vmem>>, %arg5: memref<1x128xf32, #tpu.memory_space<vmem>>, %arg6: memref<8x128xf32, #tpu.memory_space<vmem>>) attributes {dimension_semantics = [#tpu.dimension_semantics<parallel>], iteration_bounds = array<i64: 1>, scalar_prefetch = 0 : i64, scratch_operands = 0 : i64, tpu.core_type = #tpu.core_type<tc>, window_params = [{transform_indices = @transform_0, window_bounds = array<i64: 8, 4>}, {pipeline_mode = #tpu.pipeline_mode<synchronous>, transform_indices = @transform_1, window_bounds = array<i64: 4, 128>}, {pipeline_mode = #tpu.pipeline_mode<synchronous>, transform_indices = @transform_2, window_bounds = array<i64: 1, 128>}, {pipeline_mode = #tpu.pipeline_mode<synchronous>, transform_indices = @transform_3, window_bounds = array<i64: 128, 128>}, {pipeline_mode = #tpu.pipeline_mode<synchronous>, transform_indices = @transform_4, window_bounds = array<i64: 1, 128>}, {transform_indices = @transform_5, window_bounds = array<i64: 8, 128>}]} {
    %c0 = arith.constant 0 : index
    %c0_0 = arith.constant 0 : index
    %0 = vector.load %arg1[%c0, %c0_0] : memref<8x4xbf16, #tpu.memory_space<vmem>>, vector<8x4xbf16>
    %c0_1 = arith.constant 0 : index
    %c0_2 = arith.constant 0 : index
    %1 = vector.load %arg2[%c0_1, %c0_2] : memref<4x128xbf16, #tpu.memory_space<vmem>>, vector<4x128xbf16>
    %cst = arith.constant dense<0.000000e+00> : vector<8x128xf32>
    %2 = tpu.matmul %0, %1, %cst {dimension_numbers = #tpu.dot_dimension_numbers<[1], [0], [0], [1], [0, 0, 1, 1], [], []>} : vector<8x4xbf16>, vector<4x128xbf16>, vector<8x128xf32> -> vector<8x128xf32>
    %c0_3 = arith.constant 0 : index
    %c0_4 = arith.constant 0 : index
    %3 = vector.load %arg3[%c0_3, %c0_4] : memref<1x128xf32, #tpu.memory_space<vmem>>, vector<1x128xf32>
    %4 = vector.broadcast %3 : vector<1x128xf32> to vector<8x128xf32>
    %5 = arith.addf %2, %4 : vector<8x128xf32>
    %cst_5 = arith.constant 0.000000e+00 : f32
    %6 = vector.broadcast %cst_5 : f32 to vector<8x128xf32>
    %7 = arith.maximumf %5, %6 : vector<8x128xf32>
    %8 = arith.truncf %7 : vector<8x128xf32> to vector<8x128xbf16>
    %c0_6 = arith.constant 0 : index
    %c0_7 = arith.constant 0 : index
    %9 = vector.load %arg4[%c0_6, %c0_7] : memref<128x128xbf16, #tpu.memory_space<vmem>>, vector<128x128xbf16>
    %cst_8 = arith.constant dense<0.000000e+00> : vector<8x128xf32>
    %10 = tpu.matmul %8, %9, %cst_8 {dimension_numbers = #tpu.dot_dimension_numbers<[1], [0], [0], [1], [0, 0, 1, 1], [], []>} : vector<8x128xbf16>, vector<128x128xbf16>, vector<8x128xf32> -> vector<8x128xf32>
    %c0_9 = arith.constant 0 : index
    %c0_10 = arith.constant 0 : index
    %11 = vector.load %arg5[%c0_9, %c0_10] : memref<1x128xf32, #tpu.memory_space<vmem>>, vector<1x128xf32>
    %12 = vector.broadcast %11 : vector<1x128xf32> to vector<8x128xf32>
    %13 = arith.addf %10, %12 : vector<8x128xf32>
    %cst_11 = arith.constant dense<0xFF800000> : vector<8xf32>
    %14 = vector.multi_reduction <maximumf>, %13, %cst_11 [1] : vector<8x128xf32> to vector<8xf32>
    %15 = vector.shape_cast %14 : vector<8xf32> to vector<8x1xf32>
    %16 = vector.broadcast %15 : vector<8x1xf32> to vector<8x128xf32>
    %17 = arith.subf %13, %16 : vector<8x128xf32>
    %18 = math.exp %17 : vector<8x128xf32>
    %cst_12 = arith.constant dense<0.000000e+00> : vector<8xf32>
    %19 = vector.multi_reduction <add>, %18, %cst_12 [1] : vector<8x128xf32> to vector<8xf32>
    %20 = vector.shape_cast %19 : vector<8xf32> to vector<8x1xf32>
    %21 = tpu.reciprocal %20 {approx = true} : vector<8x1xf32> -> vector<8x1xf32>
    %22 = vector.broadcast %21 : vector<8x1xf32> to vector<8x128xf32>
    %23 = arith.mulf %18, %22 : vector<8x128xf32>
    %c0_13 = arith.constant 0 : index
    %c0_14 = arith.constant 0 : index
    %24 = vector.load %arg6[%c0_13, %c0_14] : memref<8x128xf32, #tpu.memory_space<vmem>>, vector<8x128xf32>
    tpu.vector_store %arg6[%c0_13, %c0_14], %23 {strides = array<i32>} : memref<8x128xf32, #tpu.memory_space<vmem>>, vector<8x128xf32>,
    return
  }
  func.func @transform_0(%arg0: i32) -> (i32, i32) {
    %c0_i32 = arith.constant 0 : i32
    %c0_i32_0 = arith.constant 0 : i32
    return %arg0, %c0_i32 : i32, i32
  }
  func.func @transform_1(%arg0: i32) -> (i32, i32) {
    %c0_i32 = arith.constant 0 : i32
    %c0_i32_0 = arith.constant 0 : i32
    %c0_i32_1 = arith.constant 0 : i32
    return %c0_i32, %c0_i32_0 : i32, i32
  }
  func.func @transform_2(%arg0: i32) -> (i32, i32) {
    %c0_i32 = arith.constant 0 : i32
    %c0_i32_0 = arith.constant 0 : i32
    %c0_i32_1 = arith.constant 0 : i32
    return %c0_i32, %c0_i32_0 : i32, i32
  }
  func.func @transform_3(%arg0: i32) -> (i32, i32) {
    %c0_i32 = arith.constant 0 : i32
    %c0_i32_0 = arith.constant 0 : i32
    %c0_i32_1 = arith.constant 0 : i32
    return %c0_i32, %c0_i32_0 : i32, i32
  }
  func.func @transform_4(%arg0: i32) -> (i32, i32) {
    %c0_i32 = arith.constant 0 : i32
    %c0_i32_0 = arith.constant 0 : i32
    %c0_i32_1 = arith.constant 0 : i32
    return %c0_i32, %c0_i32_0 : i32, i32
  }
  func.func @transform_5(%arg0: i32) -> (i32, i32) {
    %c0_i32 = arith.constant 0 : i32
    %c0_i32_0 = arith.constant 0 : i32
    return %arg0, %c0_i32 : i32, i32
  }
}

</mosaic_0001>

<bundles_post_ra>
// kernel: tpu_custom_call.1
= control target key start
LH: loop header
LB: loop body
LE: loop exit
PB: predicated region body
PF: predicated region fallthrough
CT: control target
= control target key end

     0   :  { %10 = vsyncpa [#allocation3], 0  ;;  %s417_s0 = inlined_call_operand.vmem [shape: bf16[8,4], index: 0, kind: input, shape index: {}]   ;;  %s418_s1 = inlined_call_operand.vmem [shape: bf16[4,128], index: 1, kind: input, shape index: {}]   ;;  %s419_s2 = inlined_call_operand.vmem [shape: f32[1,128], index: 2, kind: input, shape index: {}]   ;;  %s420_s3 = inlined_call_operand.hbm [shape: bf16[128,128], index: 3, kind: input, shape index: {}]   ;;  %s421_s4 = inlined_call_operand.vmem [shape: f32[1,128], index: 4, kind: input, shape index: {}]   ;;  %s422_s5 = inlined_call_operand.hbm [shape: f32[8,128], index: 5, kind: output, shape index: {}]  }
   0x1   :  { %11 = vsyncpa [#allocation4], 0  ;;  %s345_s18 = smov [#allocation2]   ;;  %s297_s22 = scalar_lea.hbm %s420_s3, 1024 }
   0x2   :  { %s23_s19 = sshll.u32 %s345_s18, 4  ;;  %p298_p0 = scmp.ne.s32.totalorder %s420_s3, %s297_s22  ;;  %s24_s19 = int_to_ptr.vmem [resolvable:$true] %s23_s19 }
   0x3   :  { %p301_p1 = scmp.lt.u32.totalorder %s297_s22, %s420_s3 }
   0x5   :  { %p303_p2 = pnand %p301_p1, %p298_p0 }
   0x7   :  { %306 = shalt.err (!%p303_p2)
}
   0x8   :  { %s307_s27 = scalar_lea.vmem %s24_s19, 1024  ;;  %p312_p4 = scmp.lt.s32.totalorder %s24_s19, %s24_s19 }
   0x9   :  { %p308_p3 = scmp.ne.s32.totalorder %s24_s19, %s307_s27  ;;  %p313_p5 = scmp.lt.s32.totalorder %s307_s27, %s307_s27 }
   0xb   :  { %p314_p6 = por %p313_p5, %p312_p4 }
   0xd   :  { %p315_p7 = pnand %p314_p6, %p308_p3 }
   0xf   :  { %318 = shalt.err (!%p315_p7)
}
  0x10   :  { %s346_s28 = smov 64   ;;  %s347_s29 = smov 4  }
  0x11   :  { %29 = dma.hbm_to_vmem [thread:$0]  %s420_s3, 1024, %s24_s19, [#allocation3], %s346_s28, %s346_s28, %s347_s29  }
  0x12   :  { %341 = dma.done.wait [#allocation3], 1024  }
  0x13   :  { %342 = vsyncadd [#allocation3], 4294966272  ;;  %v348_v0 = vmov 0.0   ;;  %vm349_vm0 = vmmov 0   ;;  %vm49_vm1 = vcmask 1041408   ;;  %vm45_vm2 = vcmask 31744  }
  0x14   :  { %253 = vmatprep.subr.bf16.mxu0 %v348_v0  ;;  %255 = vmatprep.mubr.msk.bf16.mxu0 %vm349_vm0, %v348_v0  ;;  %v37_v1 = vld [vmem:[%s418_s1] sm:$0x3]  ;;  %v286_v5 = vld [vmem:[#allocation2 + $0x8] sm:$0xff]   ;;  %v287_v6 = vld [vmem:[#allocation2 + $0x10] sm:$0xff]  }
  0x15   :  { %259 = vmatprep.subr.bf16.mxu1 %v348_v0  ;;  %275 = vmatprep.mubr.msk.bf16.mxu1 %vm349_vm0, %v348_v0  ;;  %v51_v2 = vsel %vm49_vm1, %v37_v1, 0  ;;  %v285_v3 = vld [vmem:[#allocation2] sm:$0xff]   ;;  %v288_v7 = vld [vmem:[#allocation2 + $0x18] sm:$0xff]   ;;  %v290_v9 = vld [vmem:[#allocation2 + $0x28] sm:$0xff]  }
  0x16   :  { %254 = vmatpush3.bf16.msra.mxu0 %v51_v2  ;;  %v36_v4 = vld [vmem:[%s417_s0] sm:$0xf]  ;;  %260 = vmatpush3.bf16.msra.mxu1 %v285_v3  ;;  %v291_v10 = vld [vmem:[#allocation2 + $0x30] sm:$0xff]   ;;  %v292_v11 = vld [vmem:[#allocation2 + $0x38] sm:$0xff]  }
  0x17   :  { %261 = vmatprep.subr.bf16.mxu1 %v348_v0  ;;  %v289_v8 = vld [vmem:[#allocation2 + $0x20] sm:$0xff]  }
  0x18   :  { %v231_v12 = vld [vmem:[%s419_s2] ss:$0 sm:$0xff]  ;;  %s350_s2 = smov [#allocation5]  }
  0x19   :  { %256 = vmatmul.mubr.msk.bf16.vlgmr.msra.gmra.mrb[0].mxu0 %vm45_vm2, %v36_v4  ;;  %v233_v20 = vld [vmem:[%s421_s4] ss:$0 sm:$0xff]  ;;  %s222_s12 = sshll.u32 %s350_s2, 4  ;;  %s223_s12 = int_to_ptr.vmem [resolvable:$true] %s222_s12 }
  0x1a   :  { %262 = vmatpush3.bf16.msra.mxu1 %v286_v5  ;;  %s319_s4 = scalar_lea.vmem %s223_s12, 128  ;;  %p324_p9 = scmp.lt.s32.totalorder %s223_s12, %s223_s12 }
  0x1b   :  { %263 = vmatprep.subr.bf16.mxu1 %v348_v0  ;;  %p320_p8 = scmp.ne.s32.totalorder %s223_s12, %s319_s4  ;;  %p325_p10 = scmp.lt.s32.totalorder %s319_s4, %s319_s4 }
  0x1d   :  { %p326_p11 = por %p325_p10, %p324_p9 }
  0x1e   :  { %264 = vmatpush3.bf16.msra.mxu1 %v287_v6 }
  0x1f   :  { %265 = vmatprep.subr.bf16.mxu1 %v348_v0  ;;  %p327_p12 = pnand %p326_p11, %p320_p8 }
  0x22   :  { %266 = vmatpush3.bf16.msra.mxu1 %v288_v7 }
  0x23   :  { %267 = vmatprep.subr.bf16.mxu1 %v348_v0 }
  0x26   :  { %268 = vmatpush3.bf16.msra.mxu1 %v289_v8 }
  0x27   :  { %269 = vmatprep.subr.bf16.mxu1 %v348_v0 }
  0x2a   :  { %270 = vmatpush3.bf16.msra.mxu1 %v290_v9 }
  0x2b   :  { %271 = vmatprep.subr.bf16.mxu1 %v348_v0 }
  0x2e   :  { %272 = vmatpush3.bf16.msra.mxu1 %v291_v10 }
  0x2f   :  { %273 = vmatprep.subr.bf16.mxu1 %v348_v0 }
  0x32   :  { %274 = vmatpush3.bf16.msra.mxu1 %v292_v11 }
  0xec   :  { %v87_v13 = vpop.f32.mrb[0].mxu0 }
  0xed   :  { %v88_v14 = vadd.f32 %v231_v12, %v87_v13  ;;  %v257_v15 = vpop.f32.mrb[1].mxu0 }
  0xee   :  { %v90_v16 = vpop.f32.mrb[2].mxu0 }
  0xef   :  { %v93_v17 = vmax.f32 %v88_v14, 0.0  ;;  %v258_v18 = vpop.f32.mrb[3].mxu0 }
  0xf1   :  { %v94_v19 = vpack.c.bf16 %v93_v17, %v93_v17 }
  0xf3   :  { %276 = vmatmul.mubr.bf16.vlgmr.msra.gmra.mrb[0].mxu1 %v94_v19 }
 0x1c6   :  { %v200_v21 = vpop.f32.mrb[0].mxu1 }
 0x1c7   :  { %v201_v22 = vadd.f32 %v233_v20, %v200_v21  ;;  %v277_v23 = vpop.f32.mrb[1].mxu1 }
 0x1c8   :  { %v203_v24 = vpop.f32.mrb[2].mxu1 }
 0x1c9   :  { %206 = vmax.xlane.f32.xlu0 %v201_v22  ;;  %v278_v25 = vpop.f32.mrb[3].mxu1 }
 0x256   :  { %v207_v26 = vpop.xlane.xlu0 %206 }
 0x257   :  { %v208_v27 = vsub.f32 %v201_v22, %v207_v26 }
 0x259   :  { %v209_v28 = vmul.f32 1.442695, %v208_v27 }
 0x25b   :  { %293 = vpow2.f32 %v209_v28 }
 0x265   :  { %v294_v29 = vpop.eup %293 }
 0x266   :  { %211 = vadd.xlane.f32.xlu0 %v294_v29 }
 0x2f3   :  { %v212_v30 = vpop.xlane.xlu0 %211 }
 0x2f4   :  { %295 = vrcp.f32 %v212_v30 }
 0x2fe   :  { %v296_v31 = vpop.eup %295 }
 0x2ff   :  { %v214_v32 = vmul.f32 %v296_v31, %v294_v29 }
 0x301   :  { %215 = vst [vmem:[#allocation5] sm:$0xff] %v214_v32 }
 0x302   :  { %330 = shalt.err (!%p327_p12)
}
 0x303   :  { %s331_s15 = scalar_lea.hbm %s422_s5, 128 }
 0x304   :  { %p332_p13 = scmp.ne.s32.totalorder %s422_s5, %s331_s15  ;;  %p335_p0 = scmp.lt.u32.totalorder %s331_s15, %s422_s5 }
 0x306   :  { %p337_p1 = pnand %p335_p0, %p332_p13 }
 0x308   :  { %340 = shalt.err (!%p337_p1)
}
 0x309   :  { %225 = dma.vmem_to_hbm [thread:$0]  %s223_s12, 128, %s422_s5, [#allocation4]  }
 0x30a   :  { %343 = dma.done.wait [#allocation4], 128  }
 0x30b   :  { %344 = vsyncadd [#allocation4], 4294967168 }
 0x30c   :  { %229 = vsyncpa [#allocation3], 1 }
 0x30d   :  { %230 = vsyncpa [#allocation4], 1 }

</bundles_post_ra>
